<compile_context>
chip_gen: v5e
topology: v5e:2x2
jax: 0.10.0
libtpu: 0.0.40
codegen_flags: <defaults>
</compile_context>

<pallas_src>
import jax
import jax.numpy as jnp
from jax.experimental import pallas as pl
from jax.experimental.pallas import tpu as pltpu

_LANE = 128
_MAX_LANE_WIDTH = 8192  # cap on the flattened last dim (elements)


# ----------------------------------------------------------------------------
# Shape helpers
# ----------------------------------------------------------------------------
def _resolve_shape(shape, total):
    """Resolve a single -1 like torch.view does."""
    shape = list(shape)
    if -1 in shape:
        idx = shape.index(-1)
        known = 1
        for i, s in enumerate(shape):
            if i != idx:
                known *= int(s)
        assert known > 0 and total % known == 0, "view shape incompatible with input size"
        shape[idx] = total // known
    prod = 1
    for s in shape:
        prod *= int(s)
    assert prod == total, "view shape incompatible with input size"
    return tuple(int(s) for s in shape)


def _choose_lane_width(total):
    """Largest multiple of 128 that divides `total`, capped at _MAX_LANE_WIDTH."""
    start = (min(_MAX_LANE_WIDTH, total) // _LANE) * _LANE
    for cand in range(start, _LANE - 1, -_LANE):
        if total % cand == 0:
            return cand
    return 0


def _choose_num_chunks(rows):
    """Small chunk count that divides rows exactly (no ragged final DMA)."""
    for c in (8, 4, 2):
        if rows % c == 0:
            return c
    return 1


# ----------------------------------------------------------------------------
# Pallas kernel: direct HBM -> HBM DMA copy (no grid, no VMEM bounce)
# ----------------------------------------------------------------------------
def _make_dma_copy_kernel(n_chunks, chunk_rows):
    def kernel(x_hbm, o_hbm, sems):
        if n_chunks == 1:
            copy = pltpu.make_async_copy(x_hbm, o_hbm, sems.at[0])
            copy.start()
            copy.wait()
        else:
            copies = []
            for c in range(n_chunks):
                rs = pl.ds(c * chunk_rows, chunk_rows)
                copies.append(
                    pltpu.make_async_copy(x_hbm.at[rs], o_hbm.at[rs], sems.at[c])
                )
            # Start all chunk DMAs before waiting so they stream concurrently.
            for cp in copies:
                cp.start()
            for cp in copies:
                cp.wait()

    return kernel


def _view_copy_pallas(x, out_shape):
    """Physical copy of the contiguous element stream via HBM->HBM DMA."""
    total = x.size
    itemsize = jnp.dtype(x.dtype).itemsize

    lane_width = _choose_lane_width(total)
    if lane_width == 0:
        # TODO(synk): element counts with no 128-multiple divisor fall back to a
        # metadata reshape (no copy kernel); view is metadata-only anyway.
        return x.reshape(out_shape)

    rows = total // lane_width
    n_chunks = _choose_num_chunks(rows)
    chunk_rows = rows // n_chunks

    # Flatten in C-order (the element order torch.view preserves) into a
    # lane-dense slab; this reshape is itself metadata-only.
    x_flat = x.reshape(rows, lane_width)

    y_flat = pl.pallas_call(
        _make_dma_copy_kernel(n_chunks, chunk_rows),
        out_shape=jax.ShapeDtypeStruct((rows, lane_width), x.dtype),
        in_specs=[pl.BlockSpec(memory_space=pl.ANY)],
        out_specs=pl.BlockSpec(memory_space=pl.ANY),
        scratch_shapes=[pltpu.SemaphoreType.DMA((n_chunks,))],
        cost_estimate=pl.CostEstimate(
            flops=0,
            transcendentals=0,
            bytes_accessed=2 * total * itemsize,
        ),
    )(x_flat)

    return y_flat.reshape(out_shape)


# ----------------------------------------------------------------------------
# Public API
# ----------------------------------------------------------------------------
def view_pallas(x, *shape, force_copy=False):
    """Equivalent of torch `x.view(*shape)`.

    Default path is metadata-only (zero HBM traffic), exactly matching
    torch.view on a contiguous tensor.  `force_copy=True` materializes a fresh
    buffer via the Pallas HBM->HBM DMA copy kernel.
    """
    total = x.size
    out_shape = _resolve_shape(shape, total)
    if not force_copy:
        return x.reshape(out_shape)
    return _view_copy_pallas(x, out_shape)


class ViewPallas:
    """Mirror of the PyTorch `View` module (no parameters)."""

    def __init__(self, *shape, force_copy=False):
        self.shape = shape
        self.force_copy = force_copy

    def __call__(self, x):
        return view_pallas(x, *self.shape, force_copy=self.force_copy)


if __name__ == "__main__":
    key = jax.random.PRNGKey(0)

    # NCHW input, small shapes consistent with the module.
    x = jax.random.normal(key, (2, 4, 16, 16), dtype=jnp.float32)
    ref = x.reshape(2, -1)

    # 1) Primary (metadata-only) path — the faithful .view() translation.
    y_meta = jax.block_until_ready(ViewPallas(2, -1)(x))
    assert y_meta.shape == (2, 1024) and y_meta.dtype == x.dtype
    assert jnp.array_equal(y_meta, ref), "metadata view mismatch"

    # 2) Pallas HBM->HBM DMA copy path (fresh buffer), single-chunk case.
    y_copy = jax.block_until_ready(ViewPallas(2, -1, force_copy=True)(x))
    assert y_copy.shape == (2, 1024) and y_copy.dtype == x.dtype
    assert jnp.array_equal(y_copy, ref), "Pallas DMA view mismatch (f32)"

    # 3) bf16 + multi-chunk DMA path (rows > 1 -> several concurrent DMAs).
    xb = jax.random.normal(jax.random.PRNGKey(0), (4, 8, 32, 32), dtype=jnp.bfloat16)
    yb = jax.block_until_ready(ViewPallas(4, -1, force_copy=True)(xb))
    assert yb.shape == (4, 8192) and yb.dtype == jnp.bfloat16
    assert jnp.array_equal(yb, xb.reshape(4, -1)), "Pallas DMA view mismatch (bf16)"

    print("KERNEL_OK")
</pallas_src>

<mosaic_0001>
module attributes {stable_mosaic.version = 11 : i64} {
  func.func @kernel(%arg0: memref<1x2048xf32, #tpu.memory_space<any>>, %arg1: memref<1x2048xf32, #tpu.memory_space<any>>, %arg2: memref<1x!tpu.dma_semaphore, #tpu.memory_space<semaphore_mem>>) attributes {dimension_semantics = [], scalar_prefetch = 0 : i64, scratch_operands = 1 : i64, tpu.core_type = #tpu.core_type<tc>} {
    %c0_i32 = arith.constant 0 : i32
    %0 = tpu.memref_slice %arg2[%c0_i32] : memref<1x!tpu.dma_semaphore, #tpu.memory_space<semaphore_mem>> -> memref<1x!tpu.dma_semaphore, #tpu.memory_space<semaphore_mem>>
    %1 = tpu.memref_squeeze %0 : memref<1x!tpu.dma_semaphore, #tpu.memory_space<semaphore_mem>> -> memref<!tpu.dma_semaphore, #tpu.memory_space<semaphore_mem>>
    tpu.enqueue_dma source(%arg0 : memref<1x2048xf32, #tpu.memory_space<any>>) target(%arg1 : memref<1x2048xf32, #tpu.memory_space<any>>) target_semaphore(%1 : memref<!tpu.dma_semaphore, #tpu.memory_space<semaphore_mem>>)
    %c0_i32_0 = arith.constant 0 : i32
    %2 = tpu.memref_slice %arg2[%c0_i32_0] : memref<1x!tpu.dma_semaphore, #tpu.memory_space<semaphore_mem>> -> memref<1x!tpu.dma_semaphore, #tpu.memory_space<semaphore_mem>>
    %3 = tpu.memref_squeeze %2 : memref<1x!tpu.dma_semaphore, #tpu.memory_space<semaphore_mem>> -> memref<!tpu.dma_semaphore, #tpu.memory_space<semaphore_mem>>
    tpu.wait_dma2 semaphore(%3 : memref<!tpu.dma_semaphore, #tpu.memory_space<semaphore_mem>>) src(%arg0 : memref<1x2048xf32, #tpu.memory_space<any>>) dst(%arg1 : memref<1x2048xf32, #tpu.memory_space<any>>)
    return
  }
}

</mosaic_0001>

<bundles_post_ra>
// kernel: tpu_custom_call.1
= control target key start
LH: loop header
LB: loop body
LE: loop exit
PB: predicated region body
PF: predicated region fallthrough
CT: control target
= control target key end

     0   :  { %s32_s12 = smov [#allocation2]   ;;  %s33_s13 = smov [#allocation3]   ;;  %s51_s0 = inlined_call_operand.hbm [shape: f32[1,2048], index: 0, kind: input, shape index: {}]   ;;  %s52_s1 = inlined_call_operand.hbm [shape: f32[1,2048], index: 1, kind: output, shape index: {}]  }
   0x1   :  { %s10_s8 = sshll.u32 %s51_s0, 4  ;;  %s12_s11 = sshll.u32 %s52_s1, 4  ;;  %s11_s8 = int_to_ptr.hbm [resolvable:$true] %s10_s8  ;;  %s13_s11 = int_to_ptr.hbm [resolvable:$true] %s12_s11 }
   0x2   :  { %s34_s14 = smov 0  }
   0x3   :  { %16 = dma.general %s11_s8, 256, %s13_s11, %s32_s12, %s33_s13, [#allocation4], %s34_s14, 0  }
   0x4   :  { %30 = dma.done.wait [#allocation2], 256 }
   0x5   :  { %31 = vsyncadd [#allocation2], 4294967040 }
   0x6   :  { %20 = vsyncmov [#allocation2] }
   0x9   :  { %s21_s15 = vpop.sfrf %20 }
   0xa   :  { %p26_p0 = scmp.ne.s32.totalorder %s21_s15, 0 }
   0xc   :  { %25 = shalt.err (%p26_p0)  }

</bundles_post_ra>
